<compile_context>
chip_gen: v7x
topology: tpu7x:2x2x1
jax: 0.10.0
libtpu: 0.0.40
codegen_flags: <defaults>
</compile_context>

<pallas_src>
import functools
import math

import jax
import jax.numpy as jnp
from jax import lax
from jax.experimental import pallas as pl
from jax.experimental.pallas import tpu as pltpu


def mp_kernel(x_ref, xs_ref, adj_ref, wc_ref, o_ref, zt_ref, *,
              filter_number, slot_rows):
    # x_ref:   [tb, F_in, N]          node features (feature-major)
    # xs_ref:  [tb, F_in, N]          flat-reshaped skip view (wrapper-transposed)
    # adj_ref: [tb, N, N]             adjacency (bf16 on the wire, cast here)
    # wc_ref:  [F_out, (K+1)*F_sl]    combined, sublane-padded [W_flat | W2_flat]
    # o_ref:   [1, F_out, tb*N]       lane-dense output block (batch packed on lanes)
    # zt_ref:  [(K+1)*F_sl, tb*N]     VMEM scratch holding the stacked taps + skip rows
    K = filter_number
    F_sl = slot_rows
    tb, F_in, N = x_ref.shape

    if F_sl != F_in:
        # Pad rows of zt are contracted against zero Wc columns; zero them once so
        # 0 * <uninitialized VMEM> can never inject NaN/Inf into the wide matmul.
        # (Scratch persists across grid steps; only the real rows are rewritten.)
        @pl.when(pl.program_id(0) == 0)
        def _():
            zt_ref[...] = jnp.zeros_like(zt_ref)

    # Static loop: tb == 1 for large N (the grid pipelines one adjacency per step);
    # tb > 1 only for small N, where it amortizes per-step overhead and packs lanes.
    for b in range(tb):
        lane0 = b * N

        # Degree normalisation vector.  The D^-1/2 A D^-1/2 product is never
        # materialized: xk's columns are scaled instead (perf review #2).
        adj = adj_ref[b].astype(jnp.float32)                 # bf16 -> f32 for the MXU
        deg = jnp.sum(adj, axis=1, keepdims=True)            # [N, 1] row degrees
        inv = jnp.where(deg == 0.0, 0.0, lax.rsqrt(deg))     # EUP rsqrt; 0-degree -> 0
        inv_row = inv.reshape(1, N)

        # Filter taps, stacked feature-major at sublane-aligned offsets (k * F_sl).
        x0 = x_ref[b].astype(jnp.float32)                    # [F_in, N]
        zt_ref[pl.ds(0, F_in), pl.ds(lane0, N)] = x0
        xs = x0 * inv_row                                    # pre-scaled hop operand
        for k in range(1, K):
            t = jnp.dot(xs, adj, preferred_element_type=jnp.float32)
            xk = t * inv_row                                 # == x_{k-1} @ D^-1/2 A D^-1/2
            zt_ref[pl.ds(k * F_sl, F_in), pl.ds(lane0, N)] = xk
            if k + 1 < K:
                xs = xk * inv_row

        # Skip-path rows: the module's flat [B, N, F_in] reshape, presented
        # feature-major by the wrapper.
        zt_ref[pl.ds(K * F_sl, F_in), pl.ds(lane0, N)] = xs_ref[b].astype(jnp.float32)

    # One wide, lane-dense MXU matmul produces the whole output block.
    # TODO(synk): if this ever becomes compute-bound (large F_in), run with bf16
    # operands + f32 accumulation to hit the fast MXU path (perf review #9).
    out = jnp.dot(wc_ref[...], zt_ref[...], preferred_element_type=jnp.float32)
    o_ref[0] = out.astype(o_ref.dtype)


def message_passing_forward(node_feats, adj_matrix, W, W2, filter_number, *,
                            adj_dtype=jnp.bfloat16):
    """node_feats: [B, F_in, N]; adj_matrix: [B, N, N];
       W: [F_in, K, F_out]; W2: [F_in, F_out].

    Returns [B, F_out, N] — MessagePassingLayer.forward (bias=False, activation=None).

    adj_dtype: dtype used to stream the adjacency to the kernel.  bf16 is exact for
    unweighted 0/1 adjacencies (the common case); pass None to keep full precision
    for weighted graphs.
    """
    B, F_in, N = node_feats.shape
    F_out = W.shape[-1]
    K = filter_number
    F_sl = ((F_in + 7) // 8) * 8          # sublane-aligned tap-slot height

    # ---- parameter glue: reproduce the module's flat reshapes exactly, packed into
    # one combined weight with zero-padded columns matching the padded zt rows.
    W_flat = jnp.reshape(W, (F_out, K * F_in))
    W2_flat = jnp.reshape(W2, (F_out, F_in))
    Wc = jnp.zeros((F_out, (K + 1) * F_sl), jnp.float32)
    for k in range(K):
        Wc = Wc.at[:, k * F_sl:k * F_sl + F_in].set(W_flat[:, k * F_in:(k + 1) * F_in])
    Wc = Wc.at[:, K * F_sl:K * F_sl + F_in].set(W2_flat)

    # ---- adjacency dtype narrowing (perf review #1).
    adj_in = adj_matrix
    if adj_dtype is not None and adj_matrix.dtype != adj_dtype:
        adj_in = adj_matrix.astype(adj_dtype)
    adj_bytes = jnp.dtype(adj_in.dtype).itemsize
    x_bytes = jnp.dtype(node_feats.dtype).itemsize
    out_bytes = x_bytes

    # ---- skip path: the module flat-reshapes the input to [B, N, F_in]; present it
    # feature-major so the kernel never transposes.
    # TODO(synk): review #11 — fold this wrapper transpose into the kernel
    # (XLU transpose / trans_b dot); low priority while N^2 >> F_in*N.
    x_skip_T = jnp.transpose(jnp.reshape(node_feats, (B, N, F_in)), (0, 2, 1))

    # ---- VMEM-budget-aware batch block + scoped-VMEM limit (perf review #3/#4).
    try:
        vmem_cap = int(pltpu.get_tpu_info().vmem_capacity_bytes)
    except Exception:
        vmem_cap = 64 * 1024 * 1024        # v7x per-TensorCore VMEM (conservative)
    budget = int(0.70 * vmem_cap)

    def footprint(tb):
        lane_w = tb * N
        return (2 * tb * N * N * adj_bytes              # adjacency (double-buffered)
                + 2 * tb * F_in * N * x_bytes           # node features
                + 2 * tb * F_in * N * x_bytes           # skip view
                + 2 * F_out * lane_w * out_bytes        # output block
                + 2 * F_out * (K + 1) * F_sl * 4        # combined weight
                + (K + 1) * F_sl * lane_w * 4           # zt scratch
                + tb * N * N * 4)                       # in-kernel f32 cast of adjacency

    # Lane-packing cap (review #7): pack batch along lanes only when N < 128, never
    # unroll more than 8 elements in-kernel, and keep >=2 grid steps for megacore (#10).
    cap = min(8, -(-128 // N)) if N < 128 else 1
    cap = max(1, min(cap, max(1, B // 2)))
    tb = 1
    for cand in range(cap, 0, -1):
        if B % cand == 0 and footprint(cand) <= budget:
            tb = cand
            break
    lane_w = tb * N
    vmem_limit = int(min(vmem_cap, max(32 * 1024 * 1024, 2 * footprint(tb))))

    # ---- advisory cost estimate for XLA's scheduler (review #12).
    flops = B * ((K - 1) * 2 * F_in * N * N             # hop matmuls
                 + 2 * F_out * (K + 1) * F_sl * N       # wide output matmul
                 + (2 * K + 1) * F_in * N)              # D^-1/2 scalings
    bytes_accessed = (B * (N * N * adj_bytes + 2 * F_in * N * x_bytes
                           + F_out * N * out_bytes)
                      + F_out * (K + 1) * F_sl * 4)
    cost = pl.CostEstimate(flops=flops, transcendentals=B * N,
                           bytes_accessed=bytes_accessed)

    kernel = functools.partial(mp_kernel, filter_number=K, slot_rows=F_sl)
    out = pl.pallas_call(
        kernel,
        out_shape=jax.ShapeDtypeStruct((B // tb, F_out, lane_w), node_feats.dtype),
        grid_spec=pltpu.PrefetchScalarGridSpec(
            num_scalar_prefetch=0,
            grid=(B // tb,),
            in_specs=[
                pl.BlockSpec((tb, F_in, N), lambda g: (g, 0, 0)),
                pl.BlockSpec((tb, F_in, N), lambda g: (g, 0, 0)),
                pl.BlockSpec((tb, N, N), lambda g: (g, 0, 0)),
                pl.BlockSpec((F_out, (K + 1) * F_sl), lambda g: (0, 0)),
            ],
            out_specs=pl.BlockSpec((1, F_out, lane_w), lambda g: (g, 0, 0)),
            scratch_shapes=[pltpu.VMEM(((K + 1) * F_sl, lane_w), jnp.float32)],
        ),
        compiler_params=pltpu.CompilerParams(
            dimension_semantics=("parallel",),
            vmem_limit_bytes=vmem_limit),
        cost_estimate=cost,
    )(node_feats, x_skip_T, adj_in, Wc)

    # Unpack the lane-packed batch (free reshape + small transpose; only for tb > 1).
    if tb > 1:
        out = jnp.reshape(
            jnp.transpose(jnp.reshape(out, (B // tb, F_out, tb, N)), (0, 2, 1, 3)),
            (B, F_out, N))
    return out
    # TODO(synk): bias branch (`out += out + b`) and activation are skipped — the
    # module is used with bias=False, activation=None.


def mp_reference(node_feats, adj_matrix, W, W2, K):
    """Pure-JAX reference reproducing the PyTorch forward exactly."""
    B, F_in, N = node_feats.shape
    F_out = W.shape[-1]
    deg = adj_matrix.sum(axis=2)                              # row degrees
    inv = deg ** -0.5
    inv = jnp.where(jnp.isinf(inv), 0.0, inv)
    a_norm = adj_matrix * inv[:, :, None] * inv[:, None, :]
    xk = node_feats
    chunks = [xk]
    for _ in range(1, K):
        xk = jnp.einsum('bfn,bnm->bfm', xk, a_norm,
                        precision=lax.Precision.HIGHEST)
        chunks.append(xk)
    z = jnp.concatenate([jnp.transpose(c, (0, 2, 1)) for c in chunks], axis=-1)
    main = jnp.einsum('bnm,mo->bno', z, jnp.reshape(W, (F_out, K * F_in)).T,
                      precision=lax.Precision.HIGHEST)
    skip = jnp.einsum('bnf,fo->bno', jnp.reshape(node_feats, (B, N, F_in)),
                      jnp.reshape(W2, (F_out, F_in)).T,
                      precision=lax.Precision.HIGHEST)
    return jnp.transpose(main + skip, (0, 2, 1))              # [B, F_out, N]


if __name__ == "__main__":
    B, N, F_in, F_out, K = 2, 16, 8, 32, 3

    key = jax.random.PRNGKey(0)
    k1, k2, k3, k4 = jax.random.split(key, 4)

    node_feats = jax.random.normal(k1, (B, F_in, N), dtype=jnp.float32)

    # symmetric 0/1 adjacency without self-loops (bf16-exact, so the kernel's
    # narrowed adjacency stream loses nothing vs the reference)
    raw = jax.random.bernoulli(k2, 0.3, (B, N, N)).astype(jnp.float32)
    adj = jnp.clip(raw + jnp.transpose(raw, (0, 2, 1)), 0.0, 1.0)
    adj = adj * (1.0 - jnp.eye(N, dtype=jnp.float32))

    # deterministic init matching init_params()
    stdv = 1.0 / math.sqrt(F_in * K)
    W = jax.random.uniform(k3, (F_in, K, F_out), minval=-stdv, maxval=stdv,
                           dtype=jnp.float32)
    stdv2 = 1.0 / math.sqrt(F_in)
    W2 = jax.random.uniform(k4, (F_in, F_out), minval=-stdv2, maxval=stdv2,
                            dtype=jnp.float32)

    out = message_passing_forward(node_feats, adj, W, W2, K)
    out = jax.block_until_ready(out)

    ref = mp_reference(node_feats, adj, W, W2, K)
    assert out.shape == (B, F_out, N), out.shape
    assert jnp.allclose(out, ref, atol=1e-4, rtol=1e-4), \
        float(jnp.max(jnp.abs(out - ref)))

    print("KERNEL_OK")
</pallas_src>

<mosaic_0001>
module attributes {stable_mosaic.version = 11 : i64} {
  func.func @mp_kernel(%arg0: i32, %arg1: memref<1x8x16xf32, #tpu.memory_space<vmem>>, %arg2: memref<1x8x16xf32, #tpu.memory_space<vmem>>, %arg3: memref<1x16x16xbf16, #tpu.memory_space<vmem>>, %arg4: memref<32x32xf32, #tpu.memory_space<vmem>>, %arg5: memref<1x32x16xf32, #tpu.memory_space<vmem>>, %arg6: memref<32x16xf32, #tpu.memory_space<vmem>>) attributes {dimension_semantics = [#tpu.dimension_semantics<parallel>], iteration_bounds = array<i64: 2>, scalar_prefetch = 0 : i64, scratch_operands = 1 : i64, tpu.core_type = #tpu.core_type<tc>, window_params = [{transform_indices = @transform_0, window_bounds = array<i64: 1, 8, 16>}, {transform_indices = @transform_1, window_bounds = array<i64: 1, 8, 16>}, {transform_indices = @transform_2, window_bounds = array<i64: 1, 16, 16>}, {pipeline_mode = #tpu.pipeline_mode<synchronous>, transform_indices = @transform_3, window_bounds = array<i64: 32, 32>}, {transform_indices = @transform_4, window_bounds = array<i64: 1, 32, 16>}]} {
    %c0 = arith.constant 0 : index
    %c0_0 = arith.constant 0 : index
    %c0_1 = arith.constant 0 : index
    %0 = vector.load %arg3[%c0, %c0_0, %c0_1] : memref<1x16x16xbf16, #tpu.memory_space<vmem>>, vector<1x16x16xbf16>
    %1 = vector.shape_cast %0 : vector<1x16x16xbf16> to vector<16x16xbf16>
    %2 = arith.extf %1 : vector<16x16xbf16> to vector<16x16xf32>
    %cst = arith.constant dense<0.000000e+00> : vector<16xf32>
    %3 = vector.multi_reduction <add>, %2, %cst [1] : vector<16x16xf32> to vector<16xf32>
    %4 = vector.shape_cast %3 : vector<16xf32> to vector<16x1xf32>
    %cst_2 = arith.constant 0.000000e+00 : f32
    %5 = vector.broadcast %cst_2 : f32 to vector<16x1xf32>
    %6 = arith.cmpf oeq, %4, %5 : vector<16x1xf32>
    %7 = math.rsqrt %4 : vector<16x1xf32>
    %cst_3 = arith.constant 0.000000e+00 : f32
    %8 = vector.broadcast %cst_3 : f32 to vector<16x1xf32>
    %9 = arith.select %6, %8, %7 : vector<16x1xi1>, vector<16x1xf32>
    %10 = vector.shape_cast %9 : vector<16x1xf32> to vector<1x16xf32>
    %c0_4 = arith.constant 0 : index
    %c0_5 = arith.constant 0 : index
    %c0_6 = arith.constant 0 : index
    %11 = vector.load %arg1[%c0_4, %c0_5, %c0_6] : memref<1x8x16xf32, #tpu.memory_space<vmem>>, vector<1x8x16xf32>
    %12 = vector.shape_cast %11 : vector<1x8x16xf32> to vector<8x16xf32>
    %c0_7 = arith.constant 0 : index
    %c0_8 = arith.constant 0 : index
    %13 = vector.load %arg6[%c0_7, %c0_8] : memref<32x16xf32, #tpu.memory_space<vmem>>, vector<8x16xf32>
    tpu.vector_store %arg6[%c0_7, %c0_8], %12 {strides = array<i32>} : memref<32x16xf32, #tpu.memory_space<vmem>>, vector<8x16xf32>,
    %14 = vector.broadcast %10 : vector<1x16xf32> to vector<8x16xf32>
    %15 = arith.mulf %12, %14 : vector<8x16xf32>
    %cst_9 = arith.constant dense<0.000000e+00> : vector<8x16xf32>
    %16 = tpu.matmul %15, %2, %cst_9 {dimension_numbers = #tpu.dot_dimension_numbers<[1], [0], [0], [1], [0, 0, 1, 1], [], []>} : vector<8x16xf32>, vector<16x16xf32>, vector<8x16xf32> -> vector<8x16xf32>
    %17 = vector.broadcast %10 : vector<1x16xf32> to vector<8x16xf32>
    %18 = arith.mulf %16, %17 : vector<8x16xf32>
    %c8 = arith.constant 8 : index
    %c0_10 = arith.constant 0 : index
    %19 = vector.load %arg6[%c8, %c0_10] : memref<32x16xf32, #tpu.memory_space<vmem>>, vector<8x16xf32>
    tpu.vector_store %arg6[%c8, %c0_10], %18 {strides = array<i32>} : memref<32x16xf32, #tpu.memory_space<vmem>>, vector<8x16xf32>,
    %20 = vector.broadcast %10 : vector<1x16xf32> to vector<8x16xf32>
    %21 = arith.mulf %18, %20 : vector<8x16xf32>
    %cst_11 = arith.constant dense<0.000000e+00> : vector<8x16xf32>
    %22 = tpu.matmul %21, %2, %cst_11 {dimension_numbers = #tpu.dot_dimension_numbers<[1], [0], [0], [1], [0, 0, 1, 1], [], []>} : vector<8x16xf32>, vector<16x16xf32>, vector<8x16xf32> -> vector<8x16xf32>
    %23 = vector.broadcast %10 : vector<1x16xf32> to vector<8x16xf32>
    %24 = arith.mulf %22, %23 : vector<8x16xf32>
    %c16 = arith.constant 16 : index
    %c0_12 = arith.constant 0 : index
    %25 = vector.load %arg6[%c16, %c0_12] : memref<32x16xf32, #tpu.memory_space<vmem>>, vector<8x16xf32>
    tpu.vector_store %arg6[%c16, %c0_12], %24 {strides = array<i32>} : memref<32x16xf32, #tpu.memory_space<vmem>>, vector<8x16xf32>,
    %c0_13 = arith.constant 0 : index
    %c0_14 = arith.constant 0 : index
    %c0_15 = arith.constant 0 : index
    %26 = vector.load %arg2[%c0_13, %c0_14, %c0_15] : memref<1x8x16xf32, #tpu.memory_space<vmem>>, vector<1x8x16xf32>
    %27 = vector.shape_cast %26 : vector<1x8x16xf32> to vector<8x16xf32>
    %c24 = arith.constant 24 : index
    %c0_16 = arith.constant 0 : index
    %28 = vector.load %arg6[%c24, %c0_16] : memref<32x16xf32, #tpu.memory_space<vmem>>, vector<8x16xf32>
    tpu.vector_store %arg6[%c24, %c0_16], %27 {strides = array<i32>} : memref<32x16xf32, #tpu.memory_space<vmem>>, vector<8x16xf32>,
    %c0_17 = arith.constant 0 : index
    %c0_18 = arith.constant 0 : index
    %29 = vector.load %arg4[%c0_17, %c0_18] : memref<32x32xf32, #tpu.memory_space<vmem>>, vector<32x32xf32>
    %c0_19 = arith.constant 0 : index
    %c0_20 = arith.constant 0 : index
    %30 = vector.load %arg6[%c0_19, %c0_20] : memref<32x16xf32, #tpu.memory_space<vmem>>, vector<32x16xf32>
    %cst_21 = arith.constant dense<0.000000e+00> : vector<32x16xf32>
    %31 = tpu.matmul %29, %30, %cst_21 {dimension_numbers = #tpu.dot_dimension_numbers<[1], [0], [0], [1], [0, 0, 1, 1], [], []>} : vector<32x32xf32>, vector<32x16xf32>, vector<32x16xf32> -> vector<32x16xf32>
    %c0_22 = arith.constant 0 : index
    %c0_23 = arith.constant 0 : index
    %c0_24 = arith.constant 0 : index
    %32 = vector.load %arg5[%c0_22, %c0_23, %c0_24] : memref<1x32x16xf32, #tpu.memory_space<vmem>>, vector<1x32x16xf32>
    %33 = vector.shape_cast %32 : vector<1x32x16xf32> to vector<32x16xf32>
    %34 = vector.shape_cast %31 : vector<32x16xf32> to vector<1x32x16xf32>
    tpu.vector_store %arg5[%c0_22, %c0_23, %c0_24], %34 {strides = array<i32>} : memref<1x32x16xf32, #tpu.memory_space<vmem>>, vector<1x32x16xf32>,
    return
  }
  func.func @transform_0(%arg0: i32) -> (i32, i32, i32) {
    %c0_i32 = arith.constant 0 : i32
    %c0_i32_0 = arith.constant 0 : i32
    %c0_i32_1 = arith.constant 0 : i32
    return %arg0, %c0_i32, %c0_i32_0 : i32, i32, i32
  }
  func.func @transform_1(%arg0: i32) -> (i32, i32, i32) {
    %c0_i32 = arith.constant 0 : i32
    %c0_i32_0 = arith.constant 0 : i32
    %c0_i32_1 = arith.constant 0 : i32
    return %arg0, %c0_i32, %c0_i32_0 : i32, i32, i32
  }
  func.func @transform_2(%arg0: i32) -> (i32, i32, i32) {
    %c0_i32 = arith.constant 0 : i32
    %c0_i32_0 = arith.constant 0 : i32
    %c0_i32_1 = arith.constant 0 : i32
    return %arg0, %c0_i32, %c0_i32_0 : i32, i32, i32
  }
  func.func @transform_3(%arg0: i32) -> (i32, i32) {
    %c0_i32 = arith.constant 0 : i32
    %c0_i32_0 = arith.constant 0 : i32
    %c0_i32_1 = arith.constant 0 : i32
    return %c0_i32, %c0_i32_0 : i32, i32
  }
  func.func @transform_4(%arg0: i32) -> (i32, i32, i32) {
    %c0_i32 = arith.constant 0 : i32
    %c0_i32_0 = arith.constant 0 : i32
    %c0_i32_1 = arith.constant 0 : i32
    return %arg0, %c0_i32, %c0_i32_0 : i32, i32, i32
  }
}

</mosaic_0001>

<bundles_post_ra>
// kernel: tpu_custom_call.1
= control target key start
LH: loop header
LB: loop body
LE: loop exit
PB: predicated region body
PF: predicated region fallthrough
CT: control target
= control target key end

     0   :  { %s1348_s0 = inlined_call_operand.hbm [shape: f32[2,8,16], index: 0, kind: input, shape index: {}]   ;;  %s1349_s1 = inlined_call_operand.hbm [shape: f32[2,8,16], index: 1, kind: input, shape index: {}]   ;;  %s1350_s2 = inlined_call_operand.hbm [shape: bf16[2,16,16], index: 2, kind: input, shape index: {}]   ;;  %s1351_s3 = inlined_call_operand.hbm [shape: f32[32,32], index: 3, kind: input, shape index: {}]   ;;  %s1352_s4 = inlined_call_operand.vmem [shape: f32[2,32,16], index: 4, kind: output, shape index: {}]  }
   0x1   :  { %1361 = sst [smem:[#allocation14_spill]] %s1349_s1 }
   0x2   :  { %9 = vsyncpa [#allocation4], 0 }
   0x3   :  { %11 = vsyncpa [#allocation4 + $0x1], 0 }
   0x4   :  { %12 = vsyncpa [#allocation6], 0 }
   0x5   :  { %14 = vsyncpa [#allocation6 + $0x1], 0 }
   0x6   :  { %15 = vsyncpa [#allocation9], 0  ;;  %s1092_s15 = smov 0   ;;  %s1094_s16 = smov 0  }
   0x7   :  { %s1096_s17 = smov 0   ;;  %s1098_s18 = smov 0  }
   0x8 LB: > { %s1113_s19 = sadd.s32 1, %s1054_s18   ;;  %s28_s20 = sadd.s32 1, %s1050_s17  ;;  %s1054_s18 = sphi %s1098_s18, %s1380_s18   ;;  %s1050_s17 = sphi %s1096_s17, %s1379_s17   ;;  %s1046_s16 = sphi %s1094_s16, %s1378_s16   ;;  %s1042_s15 = sphi %s1092_s15, %s1377_s15  }
   0x9   : > { %s25_s21 = ssub.s32 %s1054_s18, %s1113_s19  ;;  %p35_p0 = scmp.ne.s32.totalorder %s1050_s17, %s1046_s16 }
   0xa   : > { %p26_p1 = scmp.eq.s32.totalorder %s25_s21, 0  ;;  %p36_p2 = scmp.eq.s32.totalorder %s1054_s18, 0 }
   0xb   : > { %p848_p3 = scmp.lt.s32.totalorder %s1054_s18, 2  ;;  %s1353_s23 = sand.u32 1, %s1050_s17  }
   0xc   : > { %s1123_s22 = scalar_select %p26_p1, %s1050_s17, %s28_s20  }
   0xd   : > { %p37_p4 = por %p36_p2, %p35_p0  ;;  %s1128_s24 = sshll.u32 %s1353_s23, 3 }
   0xe   : > { %1362 = sst [smem:[#allocation13_spill]] %s1123_s22  ;;  %s1131_s25 = sshll.u32 %s1054_s18, 7 }
   0xf   : > { %p1133_p5 = pnand %p848_p3, %p37_p4  ;;  %s195_s27 = sand.u32 1, %s1054_s18  }
  0x10   : > { %s1364_s1 = sld [smem:[#allocation14_spill]]  ;;  %s199_s5 = scalar_lea.vmem [#allocation5], %s1128_s24 }
  0x11   : > { %s1363_s26 = scalar_select %p1133_p5, 1, 0 }
  0x12   : > { %s206_s6 = sshll.u32 %s199_s5, 4  ;;  %s1151_s9 = scalar_lea.hbm %s1350_s2, %s1131_s25  ;;  %s1145_s6 = int_to_ptr.vmem [resolvable:$true] %s206_s6 }
  0x13   : > { %s1153_s10 = scalar_lea.sflag [#allocation6], %s195_s27  ;;  %p1159_p7 = pneg %p1133_p5 }
  0x15   : > { %s1365_s12 = scalar_select %p1159_p7, 1, 0 }
  0x16   : > { %s1142_s30 = scalar_lea.hbm %s1364_s1, %s1131_s25  ;;  %s899_s20 = scalar_lea.hbm %s1364_s1, 256 }
  0x17   : > { %s894_s11 = scalar_lea.hbm %s1142_s30, 128  ;;  %p900_p10 = scmp.lt.u32.totalorder %s1142_s30, %s1364_s1 }
  0x18   : > { %p895_p6 = scmp.ne.s32.totalorder %s1142_s30, %s894_s11  ;;  %p901_p11 = scmp.lt.u32.totalorder %s899_s20, %s894_s11 }
  0x19   : > { %p903_p13 = scmp.lt.u32.totalorder %s894_s11, %s1142_s30 }
  0x1a   : > { %p897_p8 = pnand %p1159_p7, %p895_p6  ;;  %p902_p12 = por %p901_p11, %p900_p10 }
  0x1c   : > { %p898_p9 = pneg %p897_p8  ;;  %p904_p0 = por %p903_p13, %p902_p12 }
  0x1e   : > { %p905_p1 = pnand %p904_p0, %p898_p9 }
  0x20   : > { %908 = shalt.err (!%p905_p1)
}
  0x21   : > { %s909_s27 = scalar_lea.vmem %s1145_s6, 128  ;;  %s1056_s29 = smov [#allocation5]  }
  0x22   : > { %p910_p2 = scmp.ne.s32.totalorder %s1145_s6, %s909_s27  ;;  %s914_s5 = sshll.u32 %s1056_s29, 4  ;;  %s915_s5 = int_to_ptr.vmem [resolvable:$false] %s914_s5 }
  0x23   : > { %s916_s7 = scalar_lea.vmem %s915_s5, 256  ;;  %p917_p6 = scmp.lt.s32.totalorder %s1145_s6, %s915_s5 }
  0x24   : > { %p912_p3 = pnand %p910_p2, %p1159_p7  ;;  %p918_p8 = scmp.lt.s32.totalorder %s916_s7, %s909_s27 }
  0x26   : > { %p913_p4 = pneg %p912_p3  ;;  %p919_p10 = por %p918_p8, %p917_p6 }
  0x28   : > { %p920_p11 = pnand %p919_p10, %p913_p4 }
  0x2a   : > { %923 = shalt.err (!%p920_p11)
}
  0x2b   : > { %843 = dma.hbm_to_vmem [thread:$0]  (!%p1133_p5), %s1142_s30, 128, %s1145_s6, %s1153_s10  }
  0x2c   : > { %s217_s8 = scalar_lea.vmem [#allocation7], %s1128_s24  ;;  %s1187_s13 = sadd.s32 4294967295, %s1054_s18  }
  0x2d   : > { %s224_s11 = sshll.u32 %s217_s8, 4  ;;  %p41_p9 = scmp.ne.s32.totalorder %s1046_s16, %s1042_s15  ;;  %s1184_s11 = int_to_ptr.vmem [resolvable:$true] %s224_s11 }
  0x2e   : > { %p1354_p12 = scmp.eq.s32.totalorder %s1187_s13, 0  ;;  %p736_p13 = scmp.ge.s32.totalorder %s1054_s18, 1 }
  0x2f   : > { %p151_p0 = scmp.lt.s32.totalorder %s1054_s18, 3  ;;  %s1057_s6 = smov [#allocation8]  }
  0x30   : > { %p1196_p1 = por %p1354_p12, %p41_p9  ;;  %s163_s20 = sshll.u32 %s1057_s6, 4  ;;  %s1204_s20 = int_to_ptr.vmem [resolvable:$true] %s163_s20 }
  0x31   : > { %p1200_p2 = pnand %p736_p13, %p151_p0  ;;  %s1218_s28 = scalar_lea.hbm %s1348_s0, %s1131_s25 }
  0x32   : > { %s1366_s14 = scalar_select %p1196_p1, 1, 0 }
  0x33   : > { %s1367_s30 = scalar_select %p1200_p2, 1, 0 }
  0x34   : > { %p833_p3 = pneg %p1200_p2  ;;  %s181_s27 = scalar_lea.vmem [#allocation3], %s1128_s24 }
  0x35   : > { %s188_s29 = sshll.u32 %s181_s27, 4  ;;  %s924_s8 = scalar_lea.hbm %s1351_s3, 512  ;;  %s1221_s29 = int_to_ptr.vmem [resolvable:$true] %s188_s29 }
  0x36   : > { %p1210_p4 = pnand %p833_p3, %p1354_p12  ;;  %p925_p6 = scmp.ne.s32.totalorder %s1351_s3, %s924_s8 }
  0x37   : > { %p931_p9 = scmp.lt.u32.totalorder %s924_s8, %s1351_s3 }
  0x38   : > { %p926_p8 = pneg %p1210_p4 }
  0x3a   : > { %p927_p10 = pnand %p926_p8, %p925_p6 }
  0x3c   : > { %p928_p11 = pneg %p927_p10 }
  0x3e   : > { %p933_p13 = pnand %p931_p9, %p928_p11 }
  0x40   : > { %936 = shalt.err (!%p933_p13)
}
  0x41   : > { %s937_s24 = scalar_lea.vmem %s1204_s20, 512  ;;  %p945_p1 = scmp.lt.s32.totalorder %s1204_s20, %s1204_s20 }
  0x42   : > { %p938_p0 = scmp.ne.s32.totalorder %s1204_s20, %s937_s24  ;;  %p946_p2 = scmp.lt.s32.totalorder %s937_s24, %s937_s24 }
  0x44   : > { %p940_p3 = pnand %p938_p0, %p926_p8  ;;  %p947_p5 = por %p946_p2, %p945_p1 }
  0x46   : > { %p941_p12 = pneg %p940_p3 }
  0x48   : > { %p948_p7 = pnand %p947_p5, %p941_p12 }
  0x4a   : > { %951 = shalt.err (!%p948_p7)
}
  0x4b   : > { %s1058_s23 = smov 128   ;;  %s1059_s25 = smov 8  }
  0x4c   : > { %836 = dma.hbm_to_vmem [thread:$0]  (!%p1210_p4), %s1351_s3, 512, %s1204_s20, [#allocation9], %s1058_s23, %s1058_s23, %s1059_s25  }
  0x4d   : > { %s1369_s7 = sand.u32 1, %s1050_s17   ;;  %s952_s6 = scalar_lea.hbm %s1218_s28, 128 }
  0x4e   : > { %s178_s8 = scalar_lea.sflag [#allocation4], %s1369_s7  ;;  %p953_p5 = scmp.ne.s32.totalorder %s1218_s28, %s952_s6 }
  0x4f   : > { %p1370_p7 = scmp.ne.s32.totalorder %s1365_s12, 0  ;;  %s957_s24 = scalar_lea.hbm %s1348_s0, 256 }
  0x50   : > { %p958_p2 = scmp.lt.u32.totalorder %s1218_s28, %s1348_s0  ;;  %p959_p6 = scmp.lt.u32.totalorder %s957_s24, %s952_s6 }
  0x51   : > { %p955_p12 = pnand %p953_p5, %p1370_p7  ;;  %p961_p10 = scmp.lt.u32.totalorder %s952_s6, %s1218_s28 }
  0x52   : > { %p960_p8 = por %p959_p6, %p958_p2 }
  0x53   : > { %p956_p1 = pneg %p955_p12 }
  0x54   : > { %p962_p11 = por %p961_p10, %p960_p8 }
  0x56   : > { %p963_p4 = pnand %p962_p11, %p956_p1 }
  0x58   : > { %966 = shalt.err (!%p963_p4)
}
  0x59   : > { %s967_s20 = scalar_lea.vmem %s1221_s29, 128  ;;  %s1060_s15 = smov [#allocation3]  }
  0x5a   : > { %p968_p9 = scmp.ne.s32.totalorder %s1221_s29, %s967_s20  ;;  %s972_s23 = sshll.u32 %s1060_s15, 4  ;;  %s973_s23 = int_to_ptr.vmem [resolvable:$false] %s972_s23 }
  0x5b   : > { %s974_s1 = scalar_lea.vmem %s973_s23, 256  ;;  %p975_p3 = scmp.lt.s32.totalorder %s1221_s29, %s973_s23 }
  0x5c   : > { %p970_p13 = pnand %p968_p9, %p1370_p7  ;;  %p976_p5 = scmp.lt.s32.totalorder %s974_s1, %s967_s20 }
  0x5e   : > { %p971_p0 = pneg %p970_p13  ;;  %p977_p12 = por %p976_p5, %p975_p3 }
  0x60   : > { %p978_p2 = pnand %p977_p12, %p971_p0 }
  0x62   : > { %981 = shalt.err (!%p978_p2)
}
  0x63   : > { %p1371_p1 = scmp.ne.s32.totalorder %s1363_s26, 0  ;;  %s982_s22 = scalar_lea.hbm %s1151_s9, 128 }
  0x64   : > { %p983_p6 = scmp.ne.s32.totalorder %s1151_s9, %s982_s22  ;;  %s987_s5 = scalar_lea.hbm %s1350_s2, 256 }
  0x65   : > { %840 = dma.hbm_to_vmem [thread:$0]  (!%p1371_p1), %s1218_s28, 128, %s1221_s29, %s178_s8  }
  0x66   : > { %p985_p8 = pnand %p983_p6, %p1370_p7  ;;  %p988_p11 = scmp.lt.u32.totalorder %s1151_s9, %s1350_s2 }
  0x67   : > { %p989_p4 = scmp.lt.u32.totalorder %s987_s5, %s982_s22  ;;  %p991_p13 = scmp.lt.u32.totalorder %s982_s22, %s1151_s9 }
  0x68   : > { %p986_p10 = pneg %p985_p8 }
  0x69   : > { %p990_p9 = por %p989_p4, %p988_p11 }
  0x6b   : > { %p992_p0 = por %p991_p13, %p990_p9 }
  0x6d   : > { %p993_p3 = pnand %p992_p0, %p986_p10 }
  0x6f   : > { %996 = shalt.err (!%p993_p3)
}
  0x70   : > { %s997_s28 = scalar_lea.vmem %s1184_s11, 128  ;;  %s1061_s29 = smov [#allocation7]  }
  0x71   : > { %p998_p5 = scmp.ne.s32.totalorder %s1184_s11, %s997_s28  ;;  %s1002_s8 = sshll.u32 %s1061_s29, 4  ;;  %s1003_s8 = int_to_ptr.vmem [resolvable:$false] %s1002_s8 }
  0x72   : > { %s1004_s18 = scalar_lea.vmem %s1003_s8, 256  ;;  %p1005_p6 = scmp.lt.s32.totalorder %s1184_s11, %s1003_s8 }
  0x73   : > { %p1000_p12 = pnand %p998_p5, %p1370_p7  ;;  %p1006_p8 = scmp.lt.s32.totalorder %s1004_s18, %s997_s28 }
  0x75   : > { %p1001_p2 = pneg %p1000_p12  ;;  %p1007_p11 = por %p1006_p8, %p1005_p6 }
  0x77   : > { %p1008_p4 = pnand %p1007_p11, %p1001_p2 }
  0x79   : > { %1011 = shalt.err (!%p1008_p4)
}
  0x7a   : > { %s1062_s21 = smov 64   ;;  %s1063_s24 = smov 4  }
  0x7b   : > { %846 = dma.hbm_to_vmem [thread:$0]  (!%p1371_p1), %s1151_s9, 128, %s1184_s11, %s1153_s10, %s1062_s21, %s1062_s21, %s1063_s24  }
  0x7c   : > { %p1372_p7 = scmp.ne.s32.totalorder %s1367_s30, 0 }
  0x7d   : > { %s238_s12 = sand.u32 (!%p1372_p7), 1, %s1046_s16   ;;  %p1373_p10 = scmp.ne.s32.totalorder (!%p1372_p7), %s1366_s14, 0 }
  0x7e   : > { %236 = sbr.rel (%p1372_p7) target bundleno = 969 (0x3c9), region = 36  ;;  %s1292_s20 = sshll.u32 (!%p1372_p7), %s238_s12, 3 }
  0x7f   : > { %s239_s15 = scalar_lea.sflag (!%p1372_p7), [#allocation4], %s238_s12  ;;  %s242_s23 = scalar_lea.vmem (!%p1372_p7), [#allocation3], %s1292_s20 }
  0x85   : > { %1029 = dma.done.wait (%p1373_p10), %s239_s15, 128  }
  0x86   : > { %1031 = vsyncadd (%p1373_p10), %s239_s15, 4294967168  ;;  %s247_s26 = sand.u32 1, %s1187_s13   ;;  %s251_s10 = scalar_lea.vmem [#allocation5], %s1292_s20 }
  0x87   : > { %s248_s9 = scalar_lea.sflag [#allocation6], %s247_s26 }
  0x88   : > { %1033 = dma.done.wait (%p1373_p10), %s248_s9, 256  }
  0x89   : > { %1035 = vsyncadd (%p1373_p10), %s248_s9, 4294967040  ;;  %s260_s11 = scalar_lea.vmem [#allocation7], %s1292_s20  ;;  %p1374_p1 = scmp.eq.s32.totalorder %s1187_s13, 0 }
  0x8b   : > { %1037 = dma.done.wait (%p1374_p1), [#allocation9], 512   ;;  %p1375_p9 = pmov %p1374_p1 }
  0x8c   : > { %v764_v0 = vld [vmem:[%s260_s11] sm:$0xff]   ;;  %vm308_vm0 = vcmask 130048   ;;  %v1064_v5 = vmov 0.0|0.0   ;;  %vm1065_vm1 = vmmov 0   ;;  %v1066_v7 = vmov 0.0   ;;  %v503_v31 = vld [vmem:[%s251_s10] sm:$0xff] }
  0x8d   : > { %1039 = vsyncadd (%p1375_p9), [#allocation9], 4294966784  ;;  %v765_v1 = vunpack.c.l.bf16 %v764_v0  ;;  %v766_v2 = vunpack.c.h.bf16 %v764_v0  ;;  %809 = vmatprep.subr.bf16.mxu1 %v1064_v5  ;;  %v321_v6 = vld [vmem:[%s242_s23] sm:$0xff]  ;;  %785 = vmatprep.mubr.msk.f32.mxu1 %vm1065_vm1, %v1066_v7  ;;  %v325_v9 = vlaneseq  ;;  %vm336_vm4 = vcmask 130112   ;;  %504 = vst.msk [vmem:[#allocation2 + $0x18] sm:$0xff] %vm308_vm0, %v503_v31  ;;  %v505_v32 = vld [vmem:[#allocation8] sm:$0xff] }
  0x8e   : > { %811 = vmatpush3.bf16.msra.mxu1 %v764_v0  ;;  %322 = vst.msk [vmem:[#allocation2] sm:$0xff] %vm308_vm0, %v321_v6  ;;  %vm513_vm5 = vcmask 261120   ;;  %v506_v39 = vld [vmem:[#allocation8 + $0x8] sm:$0xff]  ;;  %v507_v40 = vld [vmem:[#allocation8 + $0x10] sm:$0xff]  ;;  %v508_v41 = vld [vmem:[#allocation8 + $0x18] sm:$0xff]  ;;  %p299_p13 = scmp.lt.s32.totalorder %s1187_s13, 1 }
  0x8f   : > { %v309_v3 = vsel %vm308_vm0, %v765_v1, 0.0  ;;  %v312_v4 = vsel %vm308_vm0, %v766_v2, 0.0  ;;  %812 = vmatprep.subr.bf16.mxu1 %v1064_v5  ;;  %v326_v11 = vand.u32 127, %v325_v9  ;;  %v328_v12 = vshrl.u32 %v325_v9, 7  ;;  %803 = vmatprep.mubr.msk.f32.mxu0 %vm513_vm5, %v505_v32 }
  0x90   : > { %310 = vadd.xlane.f32.xlu0 %v309_v3  ;;  %s1382_s13 = smov (!%p299_p13, %s1187_s13), 1 }
  0x91   : > { %v331_v13 = vadd.s32 4294967288, %v326_v11  ;;  %v329_v15 = vsub.s32 %v326_v11, %v328_v12  ;;  %s762_s14 = sshll.u32 %s1382_s13, 5 }
  0x92   : > { %s303_s22 = scalar_lea.vmem %s1352_s4, %s762_s14 }
  0x93   : > { %v334_v16 = vsub.s32 %v331_v13, %v328_v12 }
  0x94   : > { %313 = vadd.xlane.f32.xlu0 %v312_v4  ;;  %v512_v36 = vld [vmem:[#allocation2 + $0x18] sm:$0xff] }
  0x95   : > { %v509_v28 = vld [vmem:[#allocation2] sm:$0xff] }
 0x11d   : > { %v311_v8 = vpop.xlane.xlu0 %310 }
 0x11e   : > { %890 = vrsqrt.f32 %v311_v8  ;;  %vm315_vm2 = vcmp.eq.f32.partialorder %v311_v8, 0.0 }
 0x121   : > { %v314_v10 = vpop.xlane.xlu0 %313 }
 0x122   : > { %892 = vrsqrt.f32 %v314_v10  ;;  %vm316_vm3 = vcmp.eq.f32.partialorder %v314_v10, 0.0 }
 0x128   : > { %v891_v14 = vpop.eup %890 }
 0x129   : > { %v319_v17 = vsel %vm315_vm2, 0.0, %v891_v14 }
 0x12a   : > { %v330_v20 = vrot.slane %v319_v17, %v329_v15 }
 0x12c   : > { %v893_v18 = vpop.eup %892 }
 0x12d   : > { %v320_v19 = vsel %vm316_vm3, 0.0, %v893_v18 }
 0x12e   : > { %v335_v21 = vrot.slane %v320_v19, %v334_v16 }
 0x130   : > { %v337_v22 = vsel %vm336_vm4, %v335_v21, %v330_v20 }
 0x131   : > { %v351_v23 = vmul.f32 %v337_v22, %v321_v6 }
 0x133   : > { %786 = vmatmul.mubr.msk.f32.vlgmr.msra.gmra.mrb[0].mxu1 %vm308_vm0, %v351_v23 }
 0x134   : > { %814 = vmatpush3.bf16.msra.mxu1 %v764_v0  ;;  %792 = vmatprep.mubr.msk.f32.mxu1 %vm1065_vm1, %v1066_v7 }
 0x206   : > { %v421_v24 = vpop.f32.mrb[0].mxu1 }
 0x207   : > { %v425_v25 = vmul.f32 %v421_v24, %v337_v22  ;;  %v787_v26 = vpop.f32.mrb[1].mxu1 }
 0x209   : > { %426 = vst.msk [vmem:[#allocation2 + $0x8] sm:$0xff] %vm308_vm0, %v425_v25  ;;  %v427_v27 = vmul.f32 %v425_v25, %v337_v22 }
 0x20b   : > { %793 = vmatmul.mubr.msk.f32.vlgmr.msra.gmra.mrb[2].mxu1 %vm308_vm0, %v427_v27 }
 0x210   : > { %v510_v29 = vld [vmem:[#allocation2 + $0x8] sm:$0xff] }
 0x211   : > { %v815_v30 = vpack.c.bf16 %v510_v29, %v509_v28 }
 0x213   : > { %816 = vmatprep.subr.bf16.mxu0 %v815_v30 }
 0x214   : > { %818 = vmatpush3.bf16.msra.mxu0 %v815_v30 }
 0x2de   : > { %v497_v33 = vpop.f32.mrb[2].mxu1 }
 0x2df   : > { %v501_v34 = vmul.f32 %v497_v33, %v337_v22  ;;  %v794_v35 = vpop.f32.mrb[3].mxu1 }
 0x2e1   : > { %502 = vst.msk [vmem:[#allocation2 + $0x10] sm:$0xff] %vm308_vm0, %v501_v34 }
 0x2e8   : > { %v511_v37 = vld [vmem:[#allocation2 + $0x10] sm:$0xff] }
 0x2e9   : > { %v819_v38 = vpack.c.bf16 %v512_v36, %v511_v37 }
 0x2eb   : > { %820 = vmatprep.subr.bf16.mxu0 %v819_v38 }
 0x2ec   : > { %822 = vmatpush3.bf16.msra.mxu0 %v819_v38 }
 0x2ef   : > { %804 = vmatmul.mubr.msk.f32.vlgmr.msra.gmra.mrb[0].mxu0 %vm513_vm5, %v506_v39 }
 0x2f0   : > { %806 = vmatprep.mubr.msk.f32.mxu0 %vm513_vm5, %v507_v40 }
 0x2f3   : > { %807 = vmatmul.mubr.msk.f32.gmra.mrb[2].mxu0 %vm513_vm5, %v508_v41 }
 0x3c2   : > { %v805_v42 = vpop.f32.mrb[0].mxu0 }
 0x3c3   : > { %612 = vst.msk [vmem:[%s303_s22 + $0x8] sm:$0xff] %vm308_vm0, %v805_v42  ;;  %v592_v43 = vpop.f32.mrb[1].mxu0 }
 0x3c4   : > { %611 = vst.msk [vmem:[%s303_s22] sm:$0xff] %vm308_vm0, %v592_v43 }
 0x3c6   : > { %v808_v44 = vpop.f32.mrb[2].mxu0 }
 0x3c7   : > { %614 = vst.msk [vmem:[%s303_s22 + $0x18] sm:$0xff] %vm308_vm0, %v808_v44  ;;  %v602_v45 = vpop.f32.mrb[3].mxu0 }
 0x3c8   : > { %613 = vst.msk [vmem:[%s303_s22 + $0x10] sm:$0xff] %vm308_vm0, %v602_v45 }
 0x3c9 PF: > { %s1376_s13 = sld [smem:[#allocation13_spill]]  ;;  %p18_p0 = scmp.ge.s32.totalorder %s1113_s19, 4  }
 0x3ca   : > { %s1377_s15 = smov %s1046_s16  ;;  %s1378_s16 = smov %s1050_s17 }
 0x3cb   : > { %s1380_s18 = smov %s1113_s19  ;;  %20 = sbr.rel (!%p18_p0) target bundleno = 8 (0x8), region = 104 }
 0x3cf   : > { %s1379_s17 = smov %s1376_s13 }
 0x3d2   :  { %636 = vsyncpa [#allocation4], 1 }
 0x3d3   :  { %638 = vsyncpa [#allocation4 + $0x1], 1 }
 0x3d4   :  { %639 = vsyncpa [#allocation6], 1 }
 0x3d5   :  { %641 = vsyncpa [#allocation6 + $0x1], 1 }
 0x3d6   :  { %642 = vsyncpa [#allocation9], 1 }

</bundles_post_ra>
